<compile_context>
chip_gen: v6e
topology: v6e:2x2x1
jax: 0.10.0
libtpu: 0.0.40
codegen_flags: <defaults>
</compile_context>

<pallas_src>
import functools

import jax
import jax.numpy as jnp
from jax.experimental import pallas as pl
from jax.experimental.pallas import tpu as pltpu


def _round_up(n, m):
    return ((n + m - 1) // m) * m


def _aux_offsets(D, L):
    """128-aligned packing offsets for the [1, AUX] side-input slab."""
    rD = _round_up(D, 128)
    r2L = _round_up(2 * L, 128)
    OM = 0                 # feature_mean             [D]
    OI = rD                # 1 / (feature_std + 1e-8) [D]
    OS = 2 * rD            # feature_std              [D]
    OB1 = 3 * rD           # encoder.0 bias           [512]
    OB2 = OB1 + 512        # encoder.3 bias           [256]
    OBML = OB2 + 256       # fc_mu | fc_logvar bias   [2L]
    OBD1 = OBML + r2L      # decoder.0 bias           [256]
    OBD2 = OBD1 + 256      # decoder.3 bias           [512]
    OBD3 = OBD2 + 512      # decoder.6 bias           [D]
    AUX = OBD3 + rD
    return OM, OI, OS, OB1, OB2, OBML, OBD1, OBD2, OBD3, AUX


def _make_vae_kernel(D, L):
    OM, OI, OS, OB1, OB2, OBML, OBD1, OBD2, OBD3, _ = _aux_offsets(D, L)
    f32 = jnp.float32
    bf16 = jnp.bfloat16

    def kernel(x_ref, eps_ref, aux_ref,
               w1_ref, w2_ref, wml_ref, wd1_ref, wd2_ref, wd3_ref,
               out_ref):
        x = x_ref[...]                                # [TB, D] f32
        mean = aux_ref[:, OM:OM + D]                  # [1, D]
        inv_std = aux_ref[:, OI:OI + D]               # 1/(std+1e-8), fit-time const
        std = aux_ref[:, OS:OS + D]

        # normalize: (x - mean) * inv_std  (divide precomputed outside)
        xn = (x - mean) * inv_std

        # encoder: Linear(D,512) -> [Dropout=id] -> ReLU -> Linear(512,256) -> ReLU
        h1 = jnp.dot(xn.astype(bf16), w1_ref[...],
                     preferred_element_type=f32) + aux_ref[:, OB1:OB1 + 512]
        h1 = jnp.maximum(h1, 0.0)
        h2 = jnp.dot(h1.astype(bf16), w2_ref[...],
                     preferred_element_type=f32) + aux_ref[:, OB2:OB2 + 256]
        h2 = jnp.maximum(h2, 0.0)

        # fused fc_mu | fc_logvar: one [256, 2L] matmul
        stats = jnp.dot(h2.astype(bf16), wml_ref[...],
                        preferred_element_type=f32) + aux_ref[:, OBML:OBML + 2 * L]
        mu = stats[:, :L]
        logvar = stats[:, L:]

        # reparameterize: z = mu + eps * exp(0.5 * logvar)
        z = mu + eps_ref[...] * jnp.exp(0.5 * logvar)

        # decoder: Linear(L,256) -> ReLU -> Linear(256,512) -> ReLU -> Linear(512,D)
        d1 = jnp.dot(z.astype(bf16), wd1_ref[...],
                     preferred_element_type=f32) + aux_ref[:, OBD1:OBD1 + 256]
        d1 = jnp.maximum(d1, 0.0)
        d2 = jnp.dot(d1.astype(bf16), wd2_ref[...],
                     preferred_element_type=f32) + aux_ref[:, OBD2:OBD2 + 512]
        d2 = jnp.maximum(d2, 0.0)
        d3 = jnp.dot(d2.astype(bf16), wd3_ref[...],
                     preferred_element_type=f32) + aux_ref[:, OBD3:OBD3 + D]

        # denormalize + single lane-dense output slab [TB, D + 2L]
        recon = d3 * std + mean
        out_ref[...] = jnp.concatenate([recon, stats], axis=-1)

    return kernel


@jax.jit
def vae_forward(x, eps, prep):
    """(recon, mu, logvar) = VAE.forward(x), fused in one Pallas kernel.

    x:    [B, D] float32
    eps:  [B, L] float32 reparameterization noise
    prep: dict from prepare_vae_params (bf16 weights + packed f32 aux slab).
    """
    B, D = x.shape
    L = eps.shape[1]
    AUX = prep["aux"].shape[1]

    # Batch tiling: big rows per tile for MXU fill; pad batch if needed.
    TB = 256 if B >= 256 else _round_up(B, 8)
    Bp = _round_up(B, TB)
    if Bp != B:
        x = jnp.pad(x, ((0, Bp - B), (0, 0)))
        eps = jnp.pad(eps, ((0, Bp - B), (0, 0)))

    kernel = _make_vae_kernel(D, L)
    w_shapes = {k: prep[k].shape for k in ("w1", "w2", "wml", "wd1", "wd2", "wd3")}

    out = pl.pallas_call(
        kernel,
        out_shape=jax.ShapeDtypeStruct((Bp, D + 2 * L), jnp.float32),
        grid_spec=pltpu.PrefetchScalarGridSpec(
            num_scalar_prefetch=0,
            grid=(Bp // TB,),
            in_specs=[
                pl.BlockSpec((TB, D), lambda i: (i, 0)),          # x
                pl.BlockSpec((TB, L), lambda i: (i, 0)),          # eps
                pl.BlockSpec((1, AUX), lambda i: (0, 0)),         # packed aux
                pl.BlockSpec(w_shapes["w1"], lambda i: (0, 0)),   # weights pinned
                pl.BlockSpec(w_shapes["w2"], lambda i: (0, 0)),
                pl.BlockSpec(w_shapes["wml"], lambda i: (0, 0)),
                pl.BlockSpec(w_shapes["wd1"], lambda i: (0, 0)),
                pl.BlockSpec(w_shapes["wd2"], lambda i: (0, 0)),
                pl.BlockSpec(w_shapes["wd3"], lambda i: (0, 0)),
            ],
            out_specs=pl.BlockSpec((TB, D + 2 * L), lambda i: (i, 0)),
        ),
        compiler_params=pltpu.CompilerParams(
            dimension_semantics=("parallel",)),
    )(
        x, eps, prep["aux"],
        prep["w1"], prep["w2"], prep["wml"],
        prep["wd1"], prep["wd2"], prep["wd3"],
    )

    out = out[:B]
    recon = out[:, :D]
    mu = out[:, D:D + L]
    logvar = out[:, D + L:]
    return recon, mu, logvar


# ------------------------- parameter construction ------------------------- #

def _init_linear(key, in_dim, out_dim):
    """nn.Linear-style init U(-1/sqrt(in), 1/sqrt(in)); weight pre-transposed
    to [in, out], bias [1, out], both f32 (master copies)."""
    kw, kb = jax.random.split(key)
    bound = 1.0 / (in_dim ** 0.5)
    w = jax.random.uniform(kw, (in_dim, out_dim), jnp.float32, -bound, bound)
    b = jax.random.uniform(kb, (1, out_dim), jnp.float32, -bound, bound)
    return w, b


def make_vae_params(key, input_dim, latent_dim):
    keys = jax.random.split(key, 7)
    p = {}
    p["w1"], p["b1"] = _init_linear(keys[0], input_dim, 512)      # encoder.0
    p["w2"], p["b2"] = _init_linear(keys[1], 512, 256)            # encoder.3
    p["wmu"], p["bmu"] = _init_linear(keys[2], 256, latent_dim)   # fc_mu
    p["wlv"], p["blv"] = _init_linear(keys[3], 256, latent_dim)   # fc_logvar
    p["wd1"], p["bd1"] = _init_linear(keys[4], latent_dim, 256)   # decoder.0
    p["wd2"], p["bd2"] = _init_linear(keys[5], 256, 512)          # decoder.3
    p["wd3"], p["bd3"] = _init_linear(keys[6], 512, input_dim)    # decoder.6
    return p


def prepare_vae_params(params, feature_mean, feature_std, input_dim, latent_dim):
    """One-time prep: bf16 weights, fused mu|logvar weight, packed aux slab."""
    D, L = input_dim, latent_dim
    OM, OI, OS, OB1, OB2, OBML, OBD1, OBD2, OBD3, AUX = _aux_offsets(D, L)
    bf16 = jnp.bfloat16

    aux = jnp.zeros((1, AUX), jnp.float32)
    aux = aux.at[:, OM:OM + D].set(feature_mean)
    aux = aux.at[:, OI:OI + D].set(1.0 / (feature_std + 1e-8))
    aux = aux.at[:, OS:OS + D].set(feature_std)
    aux = aux.at[:, OB1:OB1 + 512].set(params["b1"])
    aux = aux.at[:, OB2:OB2 + 256].set(params["b2"])
    aux = aux.at[:, OBML:OBML + 2 * L].set(
        jnp.concatenate([params["bmu"], params["blv"]], axis=1))
    aux = aux.at[:, OBD1:OBD1 + 256].set(params["bd1"])
    aux = aux.at[:, OBD2:OBD2 + 512].set(params["bd2"])
    aux = aux.at[:, OBD3:OBD3 + D].set(params["bd3"])

    return {
        "aux": aux,
        "w1": params["w1"].astype(bf16),
        "w2": params["w2"].astype(bf16),
        "wml": jnp.concatenate([params["wmu"], params["wlv"]], axis=1).astype(bf16),
        "wd1": params["wd1"].astype(bf16),
        "wd2": params["wd2"].astype(bf16),
        "wd3": params["wd3"].astype(bf16),
    }


def _reference_forward(x, eps, mean, std, p):
    """Pure-JAX f32 reference of the PyTorch forward (eval-mode dropout)."""
    xn = (x - mean) / (std + 1e-8)
    h = jnp.maximum(xn @ p["w1"] + p["b1"], 0.0)
    h = jnp.maximum(h @ p["w2"] + p["b2"], 0.0)
    mu = h @ p["wmu"] + p["bmu"]
    logvar = h @ p["wlv"] + p["blv"]
    z = mu + eps * jnp.exp(0.5 * logvar)
    d = jnp.maximum(z @ p["wd1"] + p["bd1"], 0.0)
    d = jnp.maximum(d @ p["wd2"] + p["bd2"], 0.0)
    d = d @ p["wd3"] + p["bd3"]
    return d * std + mean, mu, logvar


if __name__ == "__main__":
    INPUT_DIM = 64
    LATENT_DIM = 16
    BATCH = 8

    key = jax.random.PRNGKey(0)
    k_x, k_eps, k_mean, k_std, k_params = jax.random.split(key, 5)

    x = jax.random.normal(k_x, (BATCH, INPUT_DIM), jnp.float32)
    eps = jax.random.normal(k_eps, (BATCH, LATENT_DIM), jnp.float32)

    # Buffers (as-if set by .fit()): deterministic non-trivial mean/std.
    feature_mean = jax.random.normal(k_mean, (1, INPUT_DIM), jnp.float32) * 0.1
    feature_std = 1.0 + 0.1 * jax.random.uniform(k_std, (1, INPUT_DIM), jnp.float32)

    params = make_vae_params(k_params, INPUT_DIM, LATENT_DIM)
    prep = prepare_vae_params(params, feature_mean, feature_std, INPUT_DIM, LATENT_DIM)

    recon, mu, logvar = vae_forward(x, eps, prep)
    jax.block_until_ready((recon, mu, logvar))

    # Sanity check vs. pure-JAX f32 reference (bf16 weights => looser tolerance).
    recon_r, mu_r, logvar_r = _reference_forward(x, eps, feature_mean, feature_std, params)
    assert recon.shape == (BATCH, INPUT_DIM)
    assert mu.shape == (BATCH, LATENT_DIM)
    assert logvar.shape == (BATCH, LATENT_DIM)
    assert jnp.allclose(recon, recon_r, atol=5e-2, rtol=5e-2)
    assert jnp.allclose(mu, mu_r, atol=5e-2, rtol=5e-2)
    assert jnp.allclose(logvar, logvar_r, atol=5e-2, rtol=5e-2)

    print("KERNEL_OK")
</pallas_src>

<mosaic_0001>
module attributes {stable_mosaic.version = 11 : i64} {
  func.func @kernel(%arg0: i32, %arg1: memref<8x64xf32, #tpu.memory_space<vmem>>, %arg2: memref<8x16xf32, #tpu.memory_space<vmem>>, %arg3: memref<1x2176xf32, #tpu.memory_space<vmem>>, %arg4: memref<64x512xbf16, #tpu.memory_space<vmem>>, %arg5: memref<512x256xbf16, #tpu.memory_space<vmem>>, %arg6: memref<256x32xbf16, #tpu.memory_space<vmem>>, %arg7: memref<16x256xbf16, #tpu.memory_space<vmem>>, %arg8: memref<256x512xbf16, #tpu.memory_space<vmem>>, %arg9: memref<512x64xbf16, #tpu.memory_space<vmem>>, %arg10: memref<8x96xf32, #tpu.memory_space<vmem>>) attributes {dimension_semantics = [#tpu.dimension_semantics<parallel>], iteration_bounds = array<i64: 1>, scalar_prefetch = 0 : i64, scratch_operands = 0 : i64, tpu.core_type = #tpu.core_type<tc>, window_params = [{transform_indices = @transform_0, window_bounds = array<i64: 8, 64>}, {transform_indices = @transform_1, window_bounds = array<i64: 8, 16>}, {pipeline_mode = #tpu.pipeline_mode<synchronous>, transform_indices = @transform_2, window_bounds = array<i64: 1, 2176>}, {pipeline_mode = #tpu.pipeline_mode<synchronous>, transform_indices = @transform_3, window_bounds = array<i64: 64, 512>}, {pipeline_mode = #tpu.pipeline_mode<synchronous>, transform_indices = @transform_4, window_bounds = array<i64: 512, 256>}, {pipeline_mode = #tpu.pipeline_mode<synchronous>, transform_indices = @transform_5, window_bounds = array<i64: 256, 32>}, {pipeline_mode = #tpu.pipeline_mode<synchronous>, transform_indices = @transform_6, window_bounds = array<i64: 16, 256>}, {pipeline_mode = #tpu.pipeline_mode<synchronous>, transform_indices = @transform_7, window_bounds = array<i64: 256, 512>}, {pipeline_mode = #tpu.pipeline_mode<synchronous>, transform_indices = @transform_8, window_bounds = array<i64: 512, 64>}, {transform_indices = @transform_9, window_bounds = array<i64: 8, 96>}]} {
    %c0 = arith.constant 0 : index
    %c0_0 = arith.constant 0 : index
    %0 = vector.load %arg1[%c0, %c0_0] : memref<8x64xf32, #tpu.memory_space<vmem>>, vector<8x64xf32>
    %c0_1 = arith.constant 0 : index
    %c0_2 = arith.constant 0 : index
    %1 = vector.load %arg3[%c0_1, %c0_2] : memref<1x2176xf32, #tpu.memory_space<vmem>>, vector<1x64xf32>
    %c0_3 = arith.constant 0 : index
    %c128 = arith.constant 128 : index
    %2 = vector.load %arg3[%c0_3, %c128] : memref<1x2176xf32, #tpu.memory_space<vmem>>, vector<1x64xf32>
    %c0_4 = arith.constant 0 : index
    %c256 = arith.constant 256 : index
    %3 = vector.load %arg3[%c0_4, %c256] : memref<1x2176xf32, #tpu.memory_space<vmem>>, vector<1x64xf32>
    %4 = vector.broadcast %1 : vector<1x64xf32> to vector<8x64xf32>
    %5 = arith.subf %0, %4 : vector<8x64xf32>
    %6 = vector.broadcast %2 : vector<1x64xf32> to vector<8x64xf32>
    %7 = arith.mulf %5, %6 : vector<8x64xf32>
    %8 = arith.truncf %7 : vector<8x64xf32> to vector<8x64xbf16>
    %c0_5 = arith.constant 0 : index
    %c0_6 = arith.constant 0 : index
    %9 = vector.load %arg4[%c0_5, %c0_6] : memref<64x512xbf16, #tpu.memory_space<vmem>>, vector<64x512xbf16>
    %cst = arith.constant dense<0.000000e+00> : vector<8x512xf32>
    %10 = tpu.matmul %8, %9, %cst {dimension_numbers = #tpu.dot_dimension_numbers<[1], [0], [0], [1], [0, 0, 1, 1], [], []>} : vector<8x64xbf16>, vector<64x512xbf16>, vector<8x512xf32> -> vector<8x512xf32>
    %c0_7 = arith.constant 0 : index
    %c384 = arith.constant 384 : index
    %11 = vector.load %arg3[%c0_7, %c384] : memref<1x2176xf32, #tpu.memory_space<vmem>>, vector<1x512xf32>
    %12 = vector.broadcast %11 : vector<1x512xf32> to vector<8x512xf32>
    %13 = arith.addf %10, %12 : vector<8x512xf32>
    %cst_8 = arith.constant 0.000000e+00 : f32
    %14 = vector.broadcast %cst_8 : f32 to vector<8x512xf32>
    %15 = arith.maximumf %13, %14 : vector<8x512xf32>
    %16 = arith.truncf %15 : vector<8x512xf32> to vector<8x512xbf16>
    %c0_9 = arith.constant 0 : index
    %c0_10 = arith.constant 0 : index
    %17 = vector.load %arg5[%c0_9, %c0_10] : memref<512x256xbf16, #tpu.memory_space<vmem>>, vector<512x256xbf16>
    %cst_11 = arith.constant dense<0.000000e+00> : vector<8x256xf32>
    %18 = tpu.matmul %16, %17, %cst_11 {dimension_numbers = #tpu.dot_dimension_numbers<[1], [0], [0], [1], [0, 0, 1, 1], [], []>} : vector<8x512xbf16>, vector<512x256xbf16>, vector<8x256xf32> -> vector<8x256xf32>
    %c0_12 = arith.constant 0 : index
    %c896 = arith.constant 896 : index
    %19 = vector.load %arg3[%c0_12, %c896] : memref<1x2176xf32, #tpu.memory_space<vmem>>, vector<1x256xf32>
    %20 = vector.broadcast %19 : vector<1x256xf32> to vector<8x256xf32>
    %21 = arith.addf %18, %20 : vector<8x256xf32>
    %cst_13 = arith.constant 0.000000e+00 : f32
    %22 = vector.broadcast %cst_13 : f32 to vector<8x256xf32>
    %23 = arith.maximumf %21, %22 : vector<8x256xf32>
    %24 = arith.truncf %23 : vector<8x256xf32> to vector<8x256xbf16>
    %c0_14 = arith.constant 0 : index
    %c0_15 = arith.constant 0 : index
    %25 = vector.load %arg6[%c0_14, %c0_15] : memref<256x32xbf16, #tpu.memory_space<vmem>>, vector<256x32xbf16>
    %cst_16 = arith.constant dense<0.000000e+00> : vector<8x32xf32>
    %26 = tpu.matmul %24, %25, %cst_16 {dimension_numbers = #tpu.dot_dimension_numbers<[1], [0], [0], [1], [0, 0, 1, 1], [], []>} : vector<8x256xbf16>, vector<256x32xbf16>, vector<8x32xf32> -> vector<8x32xf32>
    %c0_17 = arith.constant 0 : index
    %c1152 = arith.constant 1152 : index
    %27 = vector.load %arg3[%c0_17, %c1152] : memref<1x2176xf32, #tpu.memory_space<vmem>>, vector<1x32xf32>
    %28 = vector.broadcast %27 : vector<1x32xf32> to vector<8x32xf32>
    %29 = arith.addf %26, %28 : vector<8x32xf32>
    %30 = vector.extract_strided_slice %29 {offsets = [0, 0], sizes = [8, 16], strides = [1, 1]} : vector<8x32xf32> to vector<8x16xf32>
    %31 = vector.extract_strided_slice %29 {offsets = [0, 16], sizes = [8, 16], strides = [1, 1]} : vector<8x32xf32> to vector<8x16xf32>
    %c0_18 = arith.constant 0 : index
    %c0_19 = arith.constant 0 : index
    %32 = vector.load %arg2[%c0_18, %c0_19] : memref<8x16xf32, #tpu.memory_space<vmem>>, vector<8x16xf32>
    %cst_20 = arith.constant 5.000000e-01 : f32
    %33 = vector.broadcast %cst_20 : f32 to vector<8x16xf32>
    %34 = arith.mulf %33, %31 : vector<8x16xf32>
    %35 = math.exp %34 : vector<8x16xf32>
    %36 = arith.mulf %32, %35 : vector<8x16xf32>
    %37 = arith.addf %30, %36 : vector<8x16xf32>
    %38 = arith.truncf %37 : vector<8x16xf32> to vector<8x16xbf16>
    %c0_21 = arith.constant 0 : index
    %c0_22 = arith.constant 0 : index
    %39 = vector.load %arg7[%c0_21, %c0_22] : memref<16x256xbf16, #tpu.memory_space<vmem>>, vector<16x256xbf16>
    %cst_23 = arith.constant dense<0.000000e+00> : vector<8x256xf32>
    %40 = tpu.matmul %38, %39, %cst_23 {dimension_numbers = #tpu.dot_dimension_numbers<[1], [0], [0], [1], [0, 0, 1, 1], [], []>} : vector<8x16xbf16>, vector<16x256xbf16>, vector<8x256xf32> -> vector<8x256xf32>
    %c0_24 = arith.constant 0 : index
    %c1280 = arith.constant 1280 : index
    %41 = vector.load %arg3[%c0_24, %c1280] : memref<1x2176xf32, #tpu.memory_space<vmem>>, vector<1x256xf32>
    %42 = vector.broadcast %41 : vector<1x256xf32> to vector<8x256xf32>
    %43 = arith.addf %40, %42 : vector<8x256xf32>
    %cst_25 = arith.constant 0.000000e+00 : f32
    %44 = vector.broadcast %cst_25 : f32 to vector<8x256xf32>
    %45 = arith.maximumf %43, %44 : vector<8x256xf32>
    %46 = arith.truncf %45 : vector<8x256xf32> to vector<8x256xbf16>
    %c0_26 = arith.constant 0 : index
    %c0_27 = arith.constant 0 : index
    %47 = vector.load %arg8[%c0_26, %c0_27] : memref<256x512xbf16, #tpu.memory_space<vmem>>, vector<256x512xbf16>
    %cst_28 = arith.constant dense<0.000000e+00> : vector<8x512xf32>
    %48 = tpu.matmul %46, %47, %cst_28 {dimension_numbers = #tpu.dot_dimension_numbers<[1], [0], [0], [1], [0, 0, 1, 1], [], []>} : vector<8x256xbf16>, vector<256x512xbf16>, vector<8x512xf32> -> vector<8x512xf32>
    %c0_29 = arith.constant 0 : index
    %c1536 = arith.constant 1536 : index
    %49 = vector.load %arg3[%c0_29, %c1536] : memref<1x2176xf32, #tpu.memory_space<vmem>>, vector<1x512xf32>
    %50 = vector.broadcast %49 : vector<1x512xf32> to vector<8x512xf32>
    %51 = arith.addf %48, %50 : vector<8x512xf32>
    %cst_30 = arith.constant 0.000000e+00 : f32
    %52 = vector.broadcast %cst_30 : f32 to vector<8x512xf32>
    %53 = arith.maximumf %51, %52 : vector<8x512xf32>
    %54 = arith.truncf %53 : vector<8x512xf32> to vector<8x512xbf16>
    %c0_31 = arith.constant 0 : index
    %c0_32 = arith.constant 0 : index
    %55 = vector.load %arg9[%c0_31, %c0_32] : memref<512x64xbf16, #tpu.memory_space<vmem>>, vector<512x64xbf16>
    %cst_33 = arith.constant dense<0.000000e+00> : vector<8x64xf32>
    %56 = tpu.matmul %54, %55, %cst_33 {dimension_numbers = #tpu.dot_dimension_numbers<[1], [0], [0], [1], [0, 0, 1, 1], [], []>} : vector<8x512xbf16>, vector<512x64xbf16>, vector<8x64xf32> -> vector<8x64xf32>
    %c0_34 = arith.constant 0 : index
    %c2048 = arith.constant 2048 : index
    %57 = vector.load %arg3[%c0_34, %c2048] : memref<1x2176xf32, #tpu.memory_space<vmem>>, vector<1x64xf32>
    %58 = vector.broadcast %57 : vector<1x64xf32> to vector<8x64xf32>
    %59 = arith.addf %56, %58 : vector<8x64xf32>
    %60 = vector.broadcast %3 : vector<1x64xf32> to vector<8x64xf32>
    %61 = arith.mulf %59, %60 : vector<8x64xf32>
    %62 = vector.broadcast %1 : vector<1x64xf32> to vector<8x64xf32>
    %63 = arith.addf %61, %62 : vector<8x64xf32>
    %64 = tpu.concatenate %63, %29 in 1 : vector<8x64xf32>, vector<8x32xf32> -> vector<8x96xf32>
    %c0_35 = arith.constant 0 : index
    %c0_36 = arith.constant 0 : index
    %65 = vector.load %arg10[%c0_35, %c0_36] : memref<8x96xf32, #tpu.memory_space<vmem>>, vector<8x96xf32>
    tpu.vector_store %arg10[%c0_35, %c0_36], %64 {strides = array<i32>} : memref<8x96xf32, #tpu.memory_space<vmem>>, vector<8x96xf32>,
    return
  }
  func.func @transform_0(%arg0: i32) -> (i32, i32) {
    %c0_i32 = arith.constant 0 : i32
    %c0_i32_0 = arith.constant 0 : i32
    return %arg0, %c0_i32 : i32, i32
  }
  func.func @transform_1(%arg0: i32) -> (i32, i32) {
    %c0_i32 = arith.constant 0 : i32
    %c0_i32_0 = arith.constant 0 : i32
    return %arg0, %c0_i32 : i32, i32
  }
  func.func @transform_2(%arg0: i32) -> (i32, i32) {
    %c0_i32 = arith.constant 0 : i32
    %c0_i32_0 = arith.constant 0 : i32
    %c0_i32_1 = arith.constant 0 : i32
    return %c0_i32, %c0_i32_0 : i32, i32
  }
  func.func @transform_3(%arg0: i32) -> (i32, i32) {
    %c0_i32 = arith.constant 0 : i32
    %c0_i32_0 = arith.constant 0 : i32
    %c0_i32_1 = arith.constant 0 : i32
    return %c0_i32, %c0_i32_0 : i32, i32
  }
  func.func @transform_4(%arg0: i32) -> (i32, i32) {
    %c0_i32 = arith.constant 0 : i32
    %c0_i32_0 = arith.constant 0 : i32
    %c0_i32_1 = arith.constant 0 : i32
    return %c0_i32, %c0_i32_0 : i32, i32
  }
  func.func @transform_5(%arg0: i32) -> (i32, i32) {
    %c0_i32 = arith.constant 0 : i32
    %c0_i32_0 = arith.constant 0 : i32
    %c0_i32_1 = arith.constant 0 : i32
    return %c0_i32, %c0_i32_0 : i32, i32
  }
  func.func @transform_6(%arg0: i32) -> (i32, i32) {
    %c0_i32 = arith.constant 0 : i32
    %c0_i32_0 = arith.constant 0 : i32
    %c0_i32_1 = arith.constant 0 : i32
    return %c0_i32, %c0_i32_0 : i32, i32
  }
  func.func @transform_7(%arg0: i32) -> (i32, i32) {
    %c0_i32 = arith.constant 0 : i32
    %c0_i32_0 = arith.constant 0 : i32
    %c0_i32_1 = arith.constant 0 : i32
    return %c0_i32, %c0_i32_0 : i32, i32
  }
  func.func @transform_8(%arg0: i32) -> (i32, i32) {
    %c0_i32 = arith.constant 0 : i32
    %c0_i32_0 = arith.constant 0 : i32
    %c0_i32_1 = arith.constant 0 : i32
    return %c0_i32, %c0_i32_0 : i32, i32
  }
  func.func @transform_9(%arg0: i32) -> (i32, i32) {
    %c0_i32 = arith.constant 0 : i32
    %c0_i32_0 = arith.constant 0 : i32
    return %arg0, %c0_i32 : i32, i32
  }
}

</mosaic_0001>

<bundles_post_ra>
// kernel: vae_forward.1
= control target key start
LH: loop header
LB: loop body
LE: loop exit
PB: predicated region body
PF: predicated region fallthrough
CT: control target
= control target key end

     0   :  { %14 = vsyncpa [#allocation3], 0  ;;  %s3033_s0 = inlined_call_operand.hbm [shape: f32[8,64], index: 0, kind: input, shape index: {}]   ;;  %s3034_s1 = inlined_call_operand.hbm [shape: f32[8,16], index: 1, kind: input, shape index: {}]   ;;  %s3035_s2 = inlined_call_operand.vmem [shape: f32[1,2176], index: 2, kind: input, shape index: {}]   ;;  %s3036_s3 = inlined_call_operand.hbm [shape: bf16[64,512], index: 3, kind: input, shape index: {}]   ;;  %s3037_s4 = inlined_call_operand.vmem [shape: bf16[512,256], index: 4, kind: input, shape index: {}]   ;;  %s3038_s5 = inlined_call_operand.vmem [shape: bf16[256,32], index: 5, kind: input, shape index: {}]   ;;  %s3039_s6 = inlined_call_operand.vmem [shape: bf16[16,256], index: 6, kind: input, shape index: {}]   ;;  %s3040_s7 = inlined_call_operand.hbm [shape: bf16[256,512], index: 7, kind: input, shape index: {}]   ;;  %s3041_s8 = inlined_call_operand.vmem [shape: bf16[512,64], index: 8, kind: input, shape index: {}]   ;;  %s3042_s9 = inlined_call_operand.vmem [shape: f32[8,96], index: 9, kind: output, shape index: {}]  }
   0x1   :  { %15 = vsyncpa [#allocation5], 0 }
   0x2   :  { %16 = vsyncpa [#allocation8], 0  ;;  %s2550_s30 = smov [#allocation4]   ;;  %s2551_s11 = smov [#allocation2]  }
   0x3   :  { %s33_s10 = sshll.u32 %s2550_s30, 4  ;;  %s23_s12 = sshll.u32 %s2551_s11, 4  ;;  %s34_s10 = int_to_ptr.vmem [resolvable:$true] %s33_s10  ;;  %s24_s12 = int_to_ptr.vmem [resolvable:$true] %s23_s12 }
   0x4   :  { %s2472_s13 = scalar_lea.vmem %s34_s10, 128  ;;  %p2477_p1 = scmp.lt.s32.totalorder %s34_s10, %s34_s10 }
   0x5   :  { %p2473_p0 = scmp.ne.s32.totalorder %s34_s10, %s2472_s13  ;;  %p2478_p2 = scmp.lt.s32.totalorder %s2472_s13, %s2472_s13 }
   0x7   :  { %p2479_p3 = por %p2478_p2, %p2477_p1 }
   0x9   :  { %p2480_p4 = pnand %p2479_p3, %p2473_p0 }
   0xb   :  { %2483 = shalt.err (!%p2480_p4)
}
   0xc   :  { %36 = dma.hbm_to_vmem [thread:$0]  %s3034_s1, 128, %s34_s10, [#allocation5]  }
   0xd   :  { %s2492_s16 = scalar_lea.vmem %s24_s12, 128  ;;  %p2497_p6 = scmp.lt.s32.totalorder %s24_s12, %s24_s12 }
   0xe   :  { %p2493_p5 = scmp.ne.s32.totalorder %s24_s12, %s2492_s16  ;;  %p2498_p7 = scmp.lt.s32.totalorder %s2492_s16, %s2492_s16 }
  0x10   :  { %p2499_p8 = por %p2498_p7, %p2497_p6 }
  0x12   :  { %p2500_p9 = pnand %p2499_p8, %p2493_p5 }
  0x14   :  { %2503 = shalt.err (!%p2500_p9)
}
  0x15   :  { %26 = dma.hbm_to_vmem [thread:$0]  %s3033_s0, 128, %s24_s12, [#allocation3]  }
  0x16   :  { %s2552_s19 = smov [#allocation6]  }
  0x17   :  { %s44_s20 = sshll.u32 %s2552_s19, 4  ;;  %s45_s20 = int_to_ptr.vmem [resolvable:$true] %s44_s20 }
  0x18   :  { %s2512_s21 = scalar_lea.vmem %s45_s20, 2048  ;;  %p2517_p11 = scmp.lt.s32.totalorder %s45_s20, %s45_s20 }
  0x19   :  { %p2513_p10 = scmp.ne.s32.totalorder %s45_s20, %s2512_s21  ;;  %p2518_p12 = scmp.lt.s32.totalorder %s2512_s21, %s2512_s21 }
  0x1b   :  { %p2519_p13 = por %p2518_p12, %p2517_p11 }
  0x1d   :  { %p2520_p0 = pnand %p2519_p13, %p2513_p10 }
  0x1f   :  { %2523 = shalt.err (!%p2520_p0)
}
  0x20   :  { %s2553_s1 = smov 256   ;;  %s2554_s22 = smov 16  }
  0x21   :  { %50 = dma.hbm_to_vmem [thread:$0]  %s3036_s3, 2048, %s45_s20, [#allocation5], %s2553_s1, %s2553_s1, %s2554_s22  }
  0x22   :  { %s2555_s25 = smov [#allocation7]  }
  0x23   :  { %s62_s26 = sshll.u32 %s2555_s25, 4  ;;  %s63_s26 = int_to_ptr.vmem [resolvable:$true] %s62_s26 }
  0x24   :  { %s2532_s0 = scalar_lea.vmem %s63_s26, 8192  ;;  %p2537_p2 = scmp.lt.s32.totalorder %s63_s26, %s63_s26 }
  0x25   :  { %p2533_p1 = scmp.ne.s32.totalorder %s63_s26, %s2532_s0  ;;  %p2538_p3 = scmp.lt.s32.totalorder %s2532_s0, %s2532_s0 }
  0x27   :  { %p2539_p4 = por %p2538_p3, %p2537_p2 }
  0x29   :  { %p2540_p5 = pnand %p2539_p4, %p2533_p1 }
  0x2b   :  { %2543 = shalt.err (!%p2540_p5)
}
  0x2c   :  { %68 = dma.hbm_to_vmem [thread:$0]  %s3040_s7, 8192, %s63_s26, [#allocation8], %s2553_s1, %s2553_s1, %s2554_s22  }
  0x2d   :  { %2544 = dma.done.wait [#allocation3], 128  }
  0x2e   :  { %2545 = vsyncadd [#allocation3], 4294967168 }
  0x2f   :  { %2546 = dma.done.wait [#allocation5], 2176  }
  0x30   :  { %2547 = vsyncadd [#allocation5], 4294965120 }
  0x31   :  { %2548 = dma.done.wait [#allocation8], 8192  }
  0x32   :  { %2549 = vsyncadd [#allocation8], 4294959104  ;;  %v2556_v0 = vmov 0   ;;  %v2194_v1 = vld [vmem:[#allocation6 + $0x64] ss:$16 sps:$4 sm:$0xff]   ;;  %vm221_vm0 = vcmask 523264  }
  0x33   :  { %257 = vmatprep.mubr.bf16.mxu1 %v2556_v0  ;;  %v2196_v2 = vld [vmem:[#allocation6 + $0x60] ss:$16 sps:$4 sm:$0xff]   ;;  %233 = vmatprep.subr.bf16.mxu1 %v2194_v1  ;;  %v2197_v3 = vld [vmem:[#allocation6 + $0x44] ss:$16 sps:$4 sm:$0xff]   ;;  %v2208_v14 = vld [vmem:[#allocation6 + $0x6c] ss:$16 sps:$4 sm:$0xff]  }
  0x34   :  { %234 = vmatpush1.bf16.msra.mxu1 %v2196_v2  ;;  %v2199_v4 = vld [vmem:[#allocation6 + $0x40] ss:$16 sps:$4 sm:$0xff]   ;;  %v2200_v5 = vld [vmem:[#allocation6 + $0x24] ss:$16 sps:$4 sm:$0xff]   ;;  %v2206_v19 = vld [vmem:[#allocation6 + $0x68] ss:$16 sps:$4 sm:$0xff]  }
  0x35   :  { %235 = vmatprep.subr.bf16.mxu1 %v2197_v3  ;;  %v84_v6 = vld [vmem:[#allocation2] sm:$0xff]  ;;  %v2218_v15 = vld [vmem:[%s3037_s4 + $0x74] ss:$8 sps:$4 sm:$0xff]   ;;  %v2220_v16 = vld [vmem:[%s3037_s4 + $0x70] ss:$8 sps:$4 sm:$0xff]   ;;  %s2558_s26 = smov 64  }
  0x36   :  { %v1917_v7 = vld [vmem:[%s3035_s2] ss:$0 sm:$0xff]  ;;  %v1918_v10 = vld [vmem:[%s3035_s2 + $0x1] ss:$0 sm:$0xff]  ;;  %v2203_v11 = vld [vmem:[#allocation6 + $0x4] ss:$16 sps:$4 sm:$0xff]   ;;  %711 = vmatprep.subr.bf16.mxu0 %v2218_v15 }
  0x37   :  { %v94_v8 = vsub.f32 %v84_v6, %v1917_v7  ;;  %v2202_v9 = vld [vmem:[#allocation6 + $0x20] ss:$16 sps:$4 sm:$0xff]   ;;  %v2221_v17 = vld [vmem:[%s3037_s4 + $0x64] ss:$8 sps:$4 sm:$0xff]   ;;  %712 = vmatpush1.bf16.msra.mxu0 %v2220_v16  ;;  %v2224_v22 = vld [vmem:[%s3037_s4 + $0x54] ss:$8 sps:$4 sm:$0xff]  }
  0x38   :  { %236 = vmatpush1.bf16.msra.mxu1 %v2199_v4  ;;  %v2205_v13 = vld [vmem:[#allocation6] ss:$16 sps:$4 sm:$0xff]   ;;  %v2211_v20 = vld [vmem:[#allocation6 + $0x4c] ss:$16 sps:$4 sm:$0xff]   ;;  %713 = vmatprep.subr.bf16.mxu0 %v2221_v17  ;;  %v2209_v23 = vld [vmem:[#allocation6 + $0x48] ss:$16 sps:$4 sm:$0xff]  }
  0x39   :  { %237 = vmatprep.subr.bf16.mxu1 %v2200_v5  ;;  %v101_v12 = vmul.f32 %v1918_v10, %v94_v8  ;;  %v2223_v21 = vld [vmem:[%s3037_s4 + $0x60] ss:$8 sps:$4 sm:$0xff]   ;;  %v2214_v24 = vld [vmem:[#allocation6 + $0x2c] ss:$16 sps:$4 sm:$0xff]   ;;  %v2226_v25 = vld [vmem:[%s3037_s4 + $0x50] ss:$8 sps:$4 sm:$0xff]  }
  0x3a   :  { %v2227_v26 = vld [vmem:[%s3037_s4 + $0x44] ss:$8 sps:$4 sm:$0xff]   ;;  %v2212_v27 = vld [vmem:[#allocation6 + $0x28] ss:$16 sps:$4 sm:$0xff]   ;;  %v2230_v30 = vld [vmem:[%s3037_s4 + $0x34] ss:$8 sps:$4 sm:$0xff]  }
  0x3b   :  { %v102_v18 = vpack.c.bf16 %v101_v12, %v101_v12  ;;  %714 = vmatpush1.bf16.msra.mxu0 %v2223_v21  ;;  %v2217_v28 = vld [vmem:[#allocation6 + $0xc] ss:$16 sps:$4 sm:$0xff]   ;;  %v2229_v29 = vld [vmem:[%s3037_s4 + $0x40] ss:$8 sps:$4 sm:$0xff]   ;;  %v2235_v33 = vld [vmem:[%s3037_s4 + $0x30] ss:$8 sps:$4 sm:$0xff]  }
  0x3c   :  { %238 = vmatpush1.bf16.msra.mxu1 %v2202_v9  ;;  %715 = vmatprep.subr.bf16.mxu0 %v2224_v22  ;;  %v2215_v31 = vld [vmem:[#allocation6 + $0x8] ss:$16 sps:$4 sm:$0xff]   ;;  %v2234_v32 = vld [vmem:[%s3037_s4 + $0x174] ss:$8 sps:$4 sm:$0xff]   ;;  %v2236_v34 = vld [vmem:[%s3037_s4 + $0x24] ss:$8 sps:$4 sm:$0xff]  }
  0x3d   :  { %239 = vmatprep.subr.bf16.mxu1 %v2203_v11  ;;  %v2232_v35 = vld [vmem:[%s3037_s4 + $0x170] ss:$8 sps:$4 sm:$0xff]   ;;  %v2240_v36 = vld [vmem:[%s3037_s4 + $0x164] ss:$8 sps:$4 sm:$0xff]   ;;  %v2241_v37 = vld [vmem:[%s3037_s4 + $0x20] ss:$8 sps:$4 sm:$0xff]  }
  0x3e   :  { %v2242_v38 = vld [vmem:[%s3037_s4 + $0x14] ss:$8 sps:$4 sm:$0xff]   ;;  %v2238_v39 = vld [vmem:[%s3037_s4 + $0x160] ss:$8 sps:$4 sm:$0xff]   ;;  %v2247_v41 = vld [vmem:[%s3037_s4 + $0x10] ss:$8 sps:$4 sm:$0xff]  }
  0x3f   :  { %716 = vmatpush1.bf16.msra.mxu0 %v2226_v25  ;;  %v2246_v40 = vld [vmem:[%s3037_s4 + $0x154] ss:$8 sps:$4 sm:$0xff]   ;;  %v2248_v42 = vld [vmem:[%s3037_s4 + $0x4] ss:$8 sps:$4 sm:$0xff]   ;;  %v2244_v43 = vld [vmem:[%s3037_s4 + $0x150] ss:$8 sps:$4 sm:$0xff]   ;;  %v121_v25 = vlaneseq }
  0x40   :  { %240 = vmatpush1.bf16.msra.mxu1 %v2205_v13  ;;  %717 = vmatprep.subr.bf16.mxu0 %v2227_v26  ;;  %v2252_v44 = vld [vmem:[%s3037_s4 + $0x144] ss:$8 sps:$4 sm:$0xff]   ;;  %v2253_v45 = vld [vmem:[%s3037_s4] ss:$8 sps:$4 sm:$0xff]   ;;  %v2254_v46 = vld [vmem:[%s3037_s4 + $0xf4] ss:$8 sps:$4 sm:$0xff]  }
  0x41   :  { %274 = vmatprep.subr.bf16.mxu1 %v2208_v14  ;;  %v2250_v47 = vld [vmem:[%s3037_s4 + $0x140] ss:$8 sps:$4 sm:$0xff]   ;;  %v2258_v48 = vld [vmem:[%s3037_s4 + $0x134] ss:$8 sps:$4 sm:$0xff]   ;;  %v2259_v49 = vld [vmem:[%s3037_s4 + $0xf0] ss:$8 sps:$4 sm:$0xff]  }
  0x42   :  { %v2260_v50 = vld [vmem:[%s3037_s4 + $0xe4] ss:$8 sps:$4 sm:$0xff]   ;;  %v2256_v51 = vld [vmem:[%s3037_s4 + $0x130] ss:$8 sps:$4 sm:$0xff]   ;;  %v2265_v53 = vld [vmem:[%s3037_s4 + $0xe0] ss:$8 sps:$4 sm:$0xff]  }
  0x43   :  { %1935 = vmatmul.mubr.msk.bf16.vlgmr.msra.gmra.mxu1 %vm221_vm0, %v102_v18  ;;  %718 = vmatpush1.bf16.msra.mxu0 %v2229_v29  ;;  %v2264_v52 = vld [vmem:[%s3037_s4 + $0x124] ss:$8 sps:$4 sm:$0xff]   ;;  %v2266_v54 = vld [vmem:[%s3037_s4 + $0xd4] ss:$8 sps:$4 sm:$0xff]   ;;  %v2262_v55 = vld [vmem:[%s3037_s4 + $0x120] ss:$8 sps:$4 sm:$0xff]  }
  0x44   :  { %275 = vmatpush1.bf16.msra.mxu1 %v2206_v19  ;;  %298 = vmatprep.mubr.bf16.mxu1 %v2556_v0  ;;  %v2270_v56 = vld [vmem:[%s3037_s4 + $0x114] ss:$8 sps:$4 sm:$0xff]   ;;  %v2271_v57 = vld [vmem:[%s3037_s4 + $0xd0] ss:$8 sps:$4 sm:$0xff]   ;;  %v2272_v58 = vld [vmem:[%s3037_s4 + $0xc4] ss:$8 sps:$4 sm:$0xff]  }
  0x45   :  { %276 = vmatprep.subr.bf16.mxu1 %v2211_v20  ;;  %719 = vmatprep.subr.bf16.mxu0 %v2230_v30  ;;  %v2268_v59 = vld [vmem:[%s3037_s4 + $0x110] ss:$8 sps:$4 sm:$0xff]   ;;  %v2276_v60 = vld [vmem:[%s3037_s4 + $0x104] ss:$8 sps:$4 sm:$0xff]   ;;  %v2277_v61 = vld [vmem:[%s3037_s4 + $0xc0] ss:$8 sps:$4 sm:$0xff]  }
  0x46   :  { %v2278_v62 = vld [vmem:[%s3037_s4 + $0xb4] ss:$8 sps:$4 sm:$0xff]   ;;  %v2274_v63 = vld [vmem:[%s3037_s4 + $0x100] ss:$8 sps:$4 sm:$0xff]   ;;  %v2283_v2 = vld [vmem:[%s3037_s4 + $0xb0] ss:$8 sps:$4 sm:$0xff]  }
  0x47   :  { %720 = vmatpush1.bf16.msra.mxu0 %v2235_v33  ;;  %v2282_v1 = vld [vmem:[%s3037_s4 + $0x1f4] ss:$8 sps:$4 sm:$0xff]   ;;  %v2284_v3 = vld [vmem:[%s3037_s4 + $0xa4] ss:$8 sps:$4 sm:$0xff]   ;;  %v2280_v4 = vld [vmem:[%s3037_s4 + $0x1f0] ss:$8 sps:$4 sm:$0xff]  }
  0x48   :  { %277 = vmatpush1.bf16.msra.mxu1 %v2209_v23  ;;  %721 = vmatprep.subr.bf16.mxu0 %v2236_v34  ;;  %v2288_v5 = vld [vmem:[%s3037_s4 + $0x1e4] ss:$8 sps:$4 sm:$0xff]   ;;  %v2289_v6 = vld [vmem:[%s3037_s4 + $0xa0] ss:$8 sps:$4 sm:$0xff]   ;;  %v2290_v8 = vld [vmem:[%s3037_s4 + $0x94] ss:$8 sps:$4 sm:$0xff]  }
  0x49   :  { %278 = vmatprep.subr.bf16.mxu1 %v2214_v24  ;;  %v2286_v7 = vld [vmem:[%s3037_s4 + $0x1e0] ss:$8 sps:$4 sm:$0xff]   ;;  %v2294_v9 = vld [vmem:[%s3037_s4 + $0x1d4] ss:$8 sps:$4 sm:$0xff]   ;;  %v2292_v10 = vld [vmem:[%s3037_s4 + $0x1d0] ss:$8 sps:$4 sm:$0xff]  }
  0x4a   :  { %v2295_v11 = vld [vmem:[%s3037_s4 + $0x90] ss:$8 sps:$4 sm:$0xff]   ;;  %v2296_v12 = vld [vmem:[%s3037_s4 + $0x84] ss:$8 sps:$4 sm:$0xff]   ;;  %v2298_v14 = vld [vmem:[%s3037_s4 + $0x1c0] ss:$8 sps:$4 sm:$0xff]  }
  0x4b   :  { %722 = vmatpush1.bf16.msra.mxu0 %v2241_v37  ;;  %v2300_v13 = vld [vmem:[%s3037_s4 + $0x1c4] ss:$8 sps:$4 sm:$0xff]   ;;  %v2301_v15 = vld [vmem:[%s3037_s4 + $0x80] ss:$8 sps:$4 sm:$0xff]   ;;  %v2304_v16 = vld [vmem:[%s3037_s4 + $0x1b4] ss:$8 sps:$4 sm:$0xff]  }
  0x4c   :  { %279 = vmatpush1.bf16.msra.mxu1 %v2212_v27  ;;  %723 = vmatprep.subr.bf16.mxu0 %v2242_v38  ;;  %v2302_v17 = vld [vmem:[%s3037_s4 + $0x1b0] ss:$8 sps:$4 sm:$0xff]   ;;  %v2307_v19 = vld [vmem:[%s3037_s4 + $0x1a4] ss:$8 sps:$4 sm:$0xff]   ;;  %v2310_v20 = vld [vmem:[%s3037_s4 + $0x194] ss:$8 sps:$4 sm:$0xff]  }
  0x4d   :  { %280 = vmatprep.subr.bf16.mxu1 %v2217_v28  ;;  %v2308_v21 = vld [vmem:[%s3037_s4 + $0x190] ss:$8 sps:$4 sm:$0xff]   ;;  %v2313_v22 = vld [vmem:[%s3037_s4 + $0x184] ss:$8 sps:$4 sm:$0xff]   ;;  %v2311_v23 = vld [vmem:[%s3037_s4 + $0x180] ss:$8 sps:$4 sm:$0xff]  }
  0x4e   :  { %v2314_v24 = vld [vmem:[%s3038_s5 + $0x78] sm:$0xff]   ;;  %v2826_v26 = vshrl.u32 %v121_v25, 7  ;;  %v119_v28 = vld [vmem:[%s3035_s2 + $0x3] sm:$0xf]  ;;  %vm1007_vm1 = vcmask 130048   ;;  %vm1908_vm2 = vcmask 785408  }
  0x4f   :  { %724 = vmatpush1.bf16.msra.mxu0 %v2247_v41  ;;  %v2315_v41 = vld [vmem:[%s3038_s5 + $0x38] sm:$0xff]  }
  0x50   :  { %281 = vmatpush1.bf16.msra.mxu1 %v2215_v31  ;;  %725 = vmatprep.subr.bf16.mxu0 %v2248_v42  ;;  %v2829_v27 = vsub.s32 0, %v2826_v26  ;;  %v2835_v29 = vsub.s32 1, %v2826_v26 }
  0x51   :  { %752 = vmatprep.subr.bf16.mxu1 %v2234_v32 }
  0x52   :  { %v124_v30 = vrot.slane %v119_v28, %v2829_v27  ;;  %v128_v31 = vrot.slane %v119_v28, %v2835_v29 }
  0x53   :  { %1936 = vmatmul.mubr.msk.bf16.vlgmr.msra.gmra.mxu1 %vm221_vm0, %v102_v18  ;;  %726 = vmatpush1.bf16.msra.mxu0 %v2253_v45  ;;  %v2305_v18 = vld [vmem:[%s3037_s4 + $0x1a0] ss:$8 sps:$4 sm:$0xff]   ;;  %v135_v45 = vsub.s32 3, %v2826_v26 }
  0x54   :  { %753 = vmatpush1.bf16.msra.mxu1 %v2232_v35  ;;  %727 = vmatprep.subr.bf16.mxu0 %v2254_v46  ;;  %v2317_v46 = vld [vmem:[%s3038_s5 + $0x30] sm:$0xff]  }
  0x55   :  { %754 = vmatprep.subr.bf16.mxu1 %v2240_v36 }
  0x57   :  { %728 = vmatpush2.bf16.msra.mxu0 %v2259_v49 }
  0x58   :  { %755 = vmatpush1.bf16.msra.mxu1 %v2238_v39  ;;  %729 = vmatprep.subr.bf16.mxu0 %v2260_v50 }
  0x59   :  { %756 = vmatprep.subr.bf16.mxu1 %v2246_v40 }
  0x5b   :  { %730 = vmatpush2.bf16.msra.mxu0 %v2265_v53 }
  0x5c   :  { %757 = vmatpush1.bf16.msra.mxu1 %v2244_v43  ;;  %731 = vmatprep.subr.bf16.mxu0 %v2266_v54  ;;  %v2316_v43 = vld [vmem:[%s3038_s5 + $0x70] sm:$0xff]  }
  0x5d   :  { %758 = vmatprep.subr.bf16.mxu1 %v2252_v44  ;;  %v131_v44 = vsub.s32 2, %v2826_v26 }
  0x5f   :  { %732 = vmatpush2.bf16.msra.mxu0 %v2271_v57 }
  0x60   :  { %759 = vmatpush1.bf16.msra.mxu1 %v2250_v47  ;;  %733 = vmatprep.subr.bf16.mxu0 %v2272_v58  ;;  %v132_v47 = vrot.slane %v119_v28, %v131_v44 }
  0x61   :  { %760 = vmatprep.subr.bf16.mxu1 %v2258_v48  ;;  %v136_v48 = vrot.slane %v119_v28, %v135_v45  ;;  %v2330_v28 = vld [vmem:[%s3039_s6] ss:$8 sps:$4 sm:$0xff]  }
  0x63   :  { %734 = vmatpush2.bf16.msra.mxu0 %v2277_v61  ;;  %v2320_v61 = vld [vmem:[%s3038_s5 + $0x60] sm:$0xff]  }
  0x64   :  { %761 = vmatpush1.bf16.msra.mxu1 %v2256_v51  ;;  %735 = vmatprep.subr.bf16.mxu0 %v2278_v62  ;;  %v2321_v62 = vld [vmem:[%s3038_s5 + $0x20] sm:$0xff]  }
  0x65   :  { %762 = vmatprep.subr.bf16.mxu1 %v2264_v52 }
  0x67   :  { %736 = vmatpush2.bf16.msra.mxu0 %v2283_v2  ;;  %v2325_v2 = vld [vmem:[%s3038_s5 + $0x10] sm:$0xff]  }
  0x68   :  { %763 = vmatpush1.bf16.msra.mxu1 %v2262_v55  ;;  %737 = vmatprep.subr.bf16.mxu0 %v2284_v3  ;;  %v2326_v3 = vld [vmem:[%s3038_s5 + $0x48] sm:$0xff]  }
  0x69   :  { %764 = vmatprep.subr.bf16.mxu1 %v2270_v56 }
  0x6b   :  { %738 = vmatpush2.bf16.msra.mxu0 %v2289_v6  ;;  %v2329_v6 = vld [vmem:[%s3038_s5] sm:$0xff]  }
  0x6c   :  { %765 = vmatpush1.bf16.msra.mxu1 %v2268_v59  ;;  %739 = vmatprep.subr.bf16.mxu0 %v2290_v8  ;;  %v2318_v59 = vld [vmem:[%s3038_s5 + $0x68] sm:$0xff]  }
  0x6d   :  { %766 = vmatprep.subr.bf16.mxu1 %v2276_v60  ;;  %v2319_v60 = vld [vmem:[%s3038_s5 + $0x28] sm:$0xff]  }
  0x6f   :  { %740 = vmatpush2.bf16.msra.mxu0 %v2295_v11  ;;  %v379_v11 = vld [vmem:[%s3035_s2 + $0x7] sm:$0x3] }
  0x70   :  { %767 = vmatpush1.bf16.msra.mxu1 %v2274_v63  ;;  %741 = vmatprep.subr.bf16.mxu0 %v2296_v12  ;;  %v2323_v63 = vld [vmem:[%s3038_s5 + $0x18] sm:$0xff]   ;;  %v384_v12 = vrot.slane %v379_v11, %v2829_v27 }
  0x71   :  { %768 = vmatprep.subr.bf16.mxu1 %v2282_v1  ;;  %v2324_v1 = vld [vmem:[%s3038_s5 + $0x50] sm:$0xff]  }
  0x73   :  { %742 = vmatpush2.bf16.msra.mxu0 %v2301_v15 }
  0x74   :  { %769 = vmatpush2.bf16.msra.mxu1 %v2280_v4  ;;  %2119 = vmatprep.subr.bf16.mxu0 %v2314_v24  ;;  %v2327_v4 = vld [vmem:[%s3038_s5 + $0x8] sm:$0xff]  }
  0x75   :  { %770 = vmatprep.subr.bf16.mxu1 %v2288_v5  ;;  %v2328_v5 = vld [vmem:[%s3038_s5 + $0x40] sm:$0xff]  }
  0x78   :  { %771 = vmatpush2.bf16.msra.mxu1 %v2286_v7 }
  0x79   :  { %772 = vmatprep.subr.bf16.mxu1 %v2294_v9 }
  0x7c   :  { %773 = vmatpush2.bf16.msra.mxu1 %v2292_v10 }
  0x7d   :  { %774 = vmatprep.subr.bf16.mxu1 %v2300_v13  ;;  %v388_v13 = vrot.slane %v379_v11, %v2835_v29 }
  0x80   :  { %775 = vmatpush2.bf16.msra.mxu1 %v2298_v14 }
  0x81   :  { %776 = vmatprep.subr.bf16.mxu1 %v2304_v16 }
  0x84   :  { %777 = vmatpush2.bf16.msra.mxu1 %v2302_v17 }
  0x85   :  { %778 = vmatprep.subr.bf16.mxu1 %v2307_v19 }
  0x88   :  { %779 = vmatpush2.bf16.msra.mxu1 %v2305_v18 }
  0x89   :  { %780 = vmatprep.subr.bf16.mxu1 %v2310_v20 }
  0x8c   :  { %781 = vmatpush2.bf16.msra.mxu1 %v2308_v21 }
  0x8d   :  { %782 = vmatprep.subr.bf16.mxu1 %v2313_v22 }
  0x90   :  { %783 = vmatpush2.bf16.msra.mxu1 %v2311_v23 }
 0x103   :  { %v259_v32 = vpop.f32.mrf.mxu1 }
 0x104   :  { %v260_v33 = vadd.f32 %v259_v32, %v124_v30  ;;  %v2332_v30 = vld [vmem:[%s3039_s6 + $0x4] ss:$8 sps:$4 sm:$0xff]   ;;  %v2001_v32 = vld [vmem:[%s3035_s2 + $0x9] ss:$0 sm:$0xff]  ;;  %s2557_s6 = smov 112  }
 0x105   :  { %v261_v34 = vpop.f32.mrf.mxu1  ;;  %1025 = vmatprep.subr.bf16.mxu1 %v2332_v30  ;;  %v2375_v30 = vld [vmem:[#allocation7] ss:$16 sps:$4 sm:$0xff]  }
 0x106   :  { %v262_v35 = vadd.f32 %v261_v34, %v128_v31  ;;  %v307_v36 = vmax.f32 %v260_v33, 0.0 }
 0x107   :  { %v263_v37 = vpop.f32.mrf.mxu1 }
 0x108   :  { %v308_v38 = vmax.f32 %v262_v35, 0.0  ;;  %v311_v42 = vpack.c.bf16 %v307_v36, %v307_v36 }
 0x109   :  { %v264_v39 = vpop.f32.mrf.mxu1 }
 0x10a   :  { %v312_v40 = vpack.c.bf16 %v308_v38, %v308_v38 }
 0x10c   :  { %743 = vmatprep.mubr.bf16.mxu0 %v312_v40  ;;  %v2335_v40 = vld [vmem:[#allocation7 + $0xe4] ss:$16 sps:$4 sm:$0xff]  }
 0x10d   :  { %744 = vmatmul.mubr.bf16.vlgmr.msra.gmra.mxu0 %v311_v42  ;;  %v2338_v42 = vld [vmem:[#allocation7 + $0xec] ss:$16 sps:$4 sm:$0xff]  }
 0x10e   :  { %2120 = vmatpush3.bf16.msra.mxu0 %v2315_v41  ;;  %v2336_v41 = vld [vmem:[#allocation7 + $0xe8] ss:$16 sps:$4 sm:$0xff]  }
 0x10f   :  { %2121 = vmatprep.subr.bf16.mxu0 %v2316_v43  ;;  %v2344_v43 = vld [vmem:[#allocation7 + $0xcc] ss:$16 sps:$4 sm:$0xff]  }
 0x112   :  { %2122 = vmatpush3.bf16.msra.mxu0 %v2317_v46  ;;  %v2342_v46 = vld [vmem:[#allocation7 + $0xc8] ss:$16 sps:$4 sm:$0xff]  }
 0x113   :  { %v300_v49 = vpop.f32.mrf.mxu1  ;;  %2123 = vmatprep.subr.bf16.mxu0 %v2318_v59  ;;  %v2378_v59 = vld [vmem:[#allocation7 + $0x8] ss:$16 sps:$4 sm:$0xff]  }
 0x114   :  { %v301_v50 = vadd.f32 %v300_v49, %v132_v47  ;;  %v2348_v49 = vld [vmem:[#allocation7 + $0xa8] ss:$16 sps:$4 sm:$0xff]  }
 0x115   :  { %v302_v51 = vpop.f32.mrf.mxu1 }
 0x116   :  { %v303_v52 = vadd.f32 %v302_v51, %v136_v48  ;;  %v309_v53 = vmax.f32 %v301_v50, 0.0  ;;  %2124 = vmatpush3.bf16.msra.mxu0 %v2319_v60  ;;  %v2350_v48 = vld [vmem:[#allocation7 + $0xac] ss:$16 sps:$4 sm:$0xff]   ;;  %v2354_v51 = vld [vmem:[#allocation7 + $0x88] ss:$16 sps:$4 sm:$0xff]  }
 0x117   :  { %v304_v54 = vpop.f32.mrf.mxu1  ;;  %2125 = vmatprep.subr.bf16.mxu0 %v2320_v61  ;;  %v2356_v50 = vld [vmem:[#allocation7 + $0x8c] ss:$16 sps:$4 sm:$0xff]   ;;  %v2384_v61 = vld [vmem:[#allocation7 + $0x1e8] ss:$16 sps:$4 sm:$0xff]  }
 0x118   :  { %v310_v55 = vmax.f32 %v303_v52, 0.0  ;;  %v313_v58 = vpack.c.bf16 %v309_v53, %v309_v53  ;;  %v2362_v52 = vld [vmem:[#allocation7 + $0x6c] ss:$16 sps:$4 sm:$0xff]   ;;  %v2360_v53 = vld [vmem:[#allocation7 + $0x68] ss:$16 sps:$4 sm:$0xff]  }
 0x119   :  { %v305_v56 = vpop.f32.mrf.mxu1  ;;  %v2368_v54 = vld [vmem:[#allocation7 + $0x4c] ss:$16 sps:$4 sm:$0xff]  }
 0x11a   :  { %v314_v57 = vpack.c.bf16 %v310_v55, %v310_v55  ;;  %2126 = vmatpush3.bf16.msra.mxu0 %v2321_v62  ;;  %v2366_v55 = vld [vmem:[#allocation7 + $0x48] ss:$16 sps:$4 sm:$0xff]   ;;  %v2374_v56 = vld [vmem:[#allocation7 + $0x2c] ss:$16 sps:$4 sm:$0xff]  }
 0x11b   :  { %v2386_v60 = vld [vmem:[#allocation7 + $0x1ec] ss:$16 sps:$4 sm:$0xff]  }
 0x11c   :  { %784 = vmatprep.mubr.bf16.mxu1 %v314_v57  ;;  %v2372_v57 = vld [vmem:[#allocation7 + $0x28] ss:$16 sps:$4 sm:$0xff]   ;;  %v2392_v62 = vld [vmem:[#allocation7 + $0x1cc] ss:$16 sps:$4 sm:$0xff]  }
 0x11d   :  { %785 = vmatmul.mubr.bf16.vlgmr.msra.gmra.mxu1 %v313_v58  ;;  %v2380_v58 = vld [vmem:[#allocation7 + $0xc] ss:$16 sps:$4 sm:$0xff]  }
 0x11e   :  { %1043 = vmatprep.mubr.bf16.mxu1 %v2556_v0  ;;  %v2322_v0 = vld [vmem:[%s3038_s5 + $0x58] sm:$0xff]   ;;  %1026 = vmatpush1.bf16.msra.mxu1 %v2330_v28  ;;  %v2377_v28 = vld [vmem:[#allocation7 + $0x4] ss:$16 sps:$4 sm:$0xff]  }
 0x11f   :  { %2127 = vmatprep.subr.bf16.mxu0 %v2322_v0  ;;  %1462 = vmatprep.subr.bf16.mxu1 %v2335_v40  ;;  %v2390_v0 = vld [vmem:[#allocation7 + $0x1c8] ss:$16 sps:$4 sm:$0xff]   ;;  %v2405_v40 = vld [vmem:[#allocation7 + $0x160] ss:$16 sps:$4 sm:$0xff]  }
 0x120   :  { %2128 = vmatpush3.bf16.msra.mxu0 %v2323_v63  ;;  %v2398_v63 = vld [vmem:[#allocation7 + $0x1ac] ss:$16 sps:$4 sm:$0xff]  }
 0x121   :  { %2129 = vmatprep.subr.bf16.mxu0 %v2324_v1  ;;  %v2396_v1 = vld [vmem:[#allocation7 + $0x1a8] ss:$16 sps:$4 sm:$0xff]  }
 0x124   :  { %2130 = vmatpush3.bf16.msra.mxu0 %v2325_v2  ;;  %v2404_v2 = vld [vmem:[#allocation7 + $0x18c] ss:$16 sps:$4 sm:$0xff]  }
 0x125   :  { %2131 = vmatprep.subr.bf16.mxu0 %v2326_v3  ;;  %v2402_v3 = vld [vmem:[#allocation7 + $0x188] ss:$16 sps:$4 sm:$0xff]  }
 0x128   :  { %2132 = vmatpush3.bf16.msra.mxu0 %v2327_v4  ;;  %v2410_v4 = vld [vmem:[#allocation7 + $0x16c] ss:$16 sps:$4 sm:$0xff]  }
 0x129   :  { %2133 = vmatprep.subr.bf16.mxu0 %v2328_v5  ;;  %v2408_v5 = vld [vmem:[#allocation7 + $0x168] ss:$16 sps:$4 sm:$0xff]  }
 0x12c   :  { %2134 = vmatpush3.bf16.msra.mxu0 %v2329_v6  ;;  %v2416_v6 = vld [vmem:[#allocation7 + $0x14c] ss:$16 sps:$4 sm:$0xff]  }
 0x12d   :  { %1503 = vmatprep.subr.bf16.mxu0 %v2338_v42  ;;  %v2411_v42 = vld [vmem:[#allocation7 + $0x140] ss:$16 sps:$4 sm:$0xff]  }
 0x1cd   :  { %v745_v7 = vpop.f32.mrf.mxu0 }
 0x1ce   :  { %v746_v14 = vadd.f32 %v745_v7, %v384_v12  ;;  %v2414_v7 = vld [vmem:[#allocation7 + $0x148] ss:$16 sps:$4 sm:$0xff]   ;;  %v2333_v12 = vld [vmem:[#allocation7 + $0xe0] ss:$16 sps:$4 sm:$0xff]  }
 0x1cf   :  { %v747_v8 = vpop.f32.mrf.mxu0 }
 0x1d0   :  { %v748_v16 = vadd.f32 %v747_v8, %v388_v13  ;;  %v972_v8 = vld [vmem:[#allocation4] sm:$0xff] }
 0x1d1   :  { %v749_v9 = vpop.f32.mrf.mxu0 }
 0x1d3   :  { %v750_v10 = vpop.f32.mrf.mxu0 }
 0x1dd   :  { %v786_v15 = vpop.f32.mrf.mxu1 }
 0x1de   :  { %v787_v17 = vadd.f32 %v786_v15, %v746_v14  ;;  %v2341_v14 = vld [vmem:[#allocation7 + $0xc4] ss:$16 sps:$4 sm:$0xff]   ;;  %v2339_v15 = vld [vmem:[#allocation7 + $0xc0] ss:$16 sps:$4 sm:$0xff]  }
 0x1df   :  { %v788_v18 = vpop.f32.mrf.mxu1 }
 0x1e0   :  { %v789_v19 = vadd.f32 %v788_v18, %v748_v16  ;;  %v793_v20 = vmax.f32 %v787_v17, 0.0  ;;  %v2347_v16 = vld [vmem:[#allocation7 + $0xa4] ss:$16 sps:$4 sm:$0xff]   ;;  %v2345_v17 = vld [vmem:[#allocation7 + $0xa0] ss:$16 sps:$4 sm:$0xff]  }
 0x1e1   :  { %v790_v21 = vpop.f32.mrf.mxu1  ;;  %v2353_v18 = vld [vmem:[#allocation7 + $0x84] ss:$16 sps:$4 sm:$0xff]  }
 0x1e2   :  { %v794_v22 = vmax.f32 %v789_v19, 0.0  ;;  %v795_v25 = vpack.c.bf16 %v793_v20, %v793_v20  ;;  %v2351_v19 = vld [vmem:[#allocation7 + $0x80] ss:$16 sps:$4 sm:$0xff]   ;;  %v2359_v20 = vld [vmem:[#allocation7 + $0x64] ss:$16 sps:$4 sm:$0xff]  }
 0x1e3   :  { %v791_v23 = vpop.f32.mrf.mxu1  ;;  %v2357_v21 = vld [vmem:[#allocation7 + $0x60] ss:$16 sps:$4 sm:$0xff]  }
 0x1e4   :  { %v796_v24 = vpack.c.bf16 %v794_v22, %v794_v22  ;;  %v2365_v22 = vld [vmem:[#allocation7 + $0x44] ss:$16 sps:$4 sm:$0xff]   ;;  %v2363_v23 = vld [vmem:[#allocation7 + $0x40] ss:$16 sps:$4 sm:$0xff]  }
 0x1e6   :  { %964 = vmatprep.mubr.bf16.mxu0 %v796_v24  ;;  %v2371_v24 = vld [vmem:[#allocation7 + $0x24] ss:$16 sps:$4 sm:$0xff]  }
 0x1e7   :  { %965 = vmatmul.mubr.bf16.vlgmr.msra.gmra.mxu0 %v795_v25  ;;  %v2369_v25 = vld [vmem:[#allocation7 + $0x20] ss:$16 sps:$4 sm:$0xff]  }
 0x1e8   :  { %1504 = vmatpush1.bf16.msra.mxu0 %v2336_v41  ;;  %v2413_v41 = vld [vmem:[#allocation7 + $0x144] ss:$16 sps:$4 sm:$0xff]  }
 0x1e9   :  { %1505 = vmatprep.subr.bf16.mxu0 %v2344_v43  ;;  %v2419_v43 = vld [vmem:[#allocation7 + $0x124] ss:$16 sps:$4 sm:$0xff]  }
 0x1ec   :  { %1506 = vmatpush1.bf16.msra.mxu0 %v2342_v46  ;;  %v2422_v46 = vld [vmem:[#allocation7 + $0x12c] ss:$16 sps:$4 sm:$0xff]  }
 0x1ed   :  { %1507 = vmatprep.subr.bf16.mxu0 %v2350_v48  ;;  %v2420_v48 = vld [vmem:[#allocation7 + $0x128] ss:$16 sps:$4 sm:$0xff]  }
 0x1f0   :  { %1508 = vmatpush1.bf16.msra.mxu0 %v2348_v49  ;;  %v2425_v49 = vld [vmem:[#allocation7 + $0x104] ss:$16 sps:$4 sm:$0xff]  }
 0x1f1   :  { %1509 = vmatprep.subr.bf16.mxu0 %v2356_v50  ;;  %v2428_v50 = vld [vmem:[#allocation7 + $0x10c] ss:$16 sps:$4 sm:$0xff]  }
 0x1f4   :  { %1510 = vmatpush1.bf16.msra.mxu0 %v2354_v51  ;;  %v2423_v51 = vld [vmem:[#allocation7 + $0x100] ss:$16 sps:$4 sm:$0xff]  }
 0x1f5   :  { %1511 = vmatprep.subr.bf16.mxu0 %v2362_v52  ;;  %v2426_v52 = vld [vmem:[#allocation7 + $0x108] ss:$16 sps:$4 sm:$0xff]  }
 0x1f8   :  { %1512 = vmatpush1.bf16.msra.mxu0 %v2360_v53  ;;  %v2429_v53 = vld [vmem:[%s3041_s8 + $0x78] sm:$0xff]  }
 0x1f9   :  { %1513 = vmatprep.subr.bf16.mxu0 %v2368_v54  ;;  %v2430_v54 = vld [vmem:[%s3041_s8 + $0xf8] sm:$0xff]  }
 0x1fc   :  { %1514 = vmatpush1.bf16.msra.mxu0 %v2366_v55  ;;  %v985_v55 = vld [vmem:[%s3035_s2 + $0xa] sm:$0x3] }
 0x1fd   :  { %1515 = vmatprep.subr.bf16.mxu0 %v2374_v56  ;;  %v990_v56 = vrot.slane %v985_v55, %v2829_v27 }
 0x200   :  { %1516 = vmatpush1.bf16.msra.mxu0 %v2372_v57  ;;  %v994_v57 = vrot.slane %v985_v55, %v2835_v29 }
 0x201   :  { %1517 = vmatprep.subr.bf16.mxu0 %v2380_v58 }
 0x204   :  { %1518 = vmatpush1.bf16.msra.mxu0 %v2378_v59 }
 0x205   :  { %1519 = vmatprep.subr.bf16.mxu0 %v2386_v60 }
 0x208   :  { %1520 = vmatpush2.bf16.msra.mxu0 %v2384_v61 }
 0x209   :  { %1521 = vmatprep.subr.bf16.mxu0 %v2392_v62 }
 0x20c   :  { %1522 = vmatpush2.bf16.msra.mxu0 %v2390_v0 }
 0x20d   :  { %1523 = vmatprep.subr.bf16.mxu0 %v2398_v63 }
 0x210   :  { %1524 = vmatpush2.bf16.msra.mxu0 %v2396_v1 }
 0x211   :  { %1525 = vmatprep.subr.bf16.mxu0 %v2404_v2 }
 0x214   :  { %1526 = vmatpush2.bf16.msra.mxu0 %v2402_v3  ;;  %v2431_v3 = vld [vmem:[%s3041_s8 + $0x38] sm:$0xff]  }
 0x215   :  { %1527 = vmatprep.subr.bf16.mxu0 %v2410_v4  ;;  %v2432_v4 = vld [vmem:[%s3041_s8 + $0xb8] sm:$0xff]  }
 0x218   :  { %1528 = vmatpush2.bf16.msra.mxu0 %v2408_v5 }
 0x219   :  { %1529 = vmatprep.subr.bf16.mxu0 %v2416_v6  ;;  %v2433_v6 = vld [vmem:[%s3041_s8 + $0x70] sm:$0xff]  }
 0x21c   :  { %1530 = vmatpush2.bf16.msra.mxu0 %v2414_v7  ;;  %v2434_v7 = vld [vmem:[%s3041_s8 + $0xf0] sm:$0xff]  }
 0x21d   :  { %1531 = vmatprep.subr.bf16.mxu0 %v2422_v46 }
 0x220   :  { %1532 = vmatpush2.bf16.msra.mxu0 %v2420_v48 }
 0x221   :  { %1533 = vmatprep.subr.bf16.mxu0 %v2428_v50 }
 0x224   :  { %1534 = vmatpush2.bf16.msra.mxu0 %v2426_v52 }
 0x225   :  { %2163 = vmatprep.subr.bf16.mxu0 %v2430_v54 }
 0x2a7   :  { %v2135_v31 = vpop.f32.mrf.mxu0 }
 0x2a9   :  { %v2136_v33 = vpop.f32.mrf.mxu0 }
 0x2aa   :  { %v2137_v34 = vadd.f32 %v2136_v33, %v2135_v31  ;;  %v2383_v31 = vld [vmem:[#allocation7 + $0x1e4] ss:$16 sps:$4 sm:$0xff]  }
 0x2ab   :  { %v2138_v35 = vpop.f32.mrf.mxu0  ;;  %v2389_v33 = vld [vmem:[#allocation7 + $0x1c4] ss:$16 sps:$4 sm:$0xff]  }
 0x2ac   :  { %v2905_v36 = vadd.f32 %v2137_v34, %v2001_v32  ;;  %v2381_v32 = vld [vmem:[#allocation7 + $0x1e0] ss:$16 sps:$4 sm:$0xff]   ;;  %v2395_v35 = vld [vmem:[#allocation7 + $0x1a4] ss:$16 sps:$4 sm:$0xff]  }
 0x2ad   :  { %v2139_v37 = vpop.f32.mrf.mxu0  ;;  %v2387_v34 = vld [vmem:[#allocation7 + $0x1c0] ss:$16 sps:$4 sm:$0xff]  }
 0x2ae   :  { %v973_v38 = vmul.f32 0.5, %v2905_v36  ;;  %v2401_v37 = vld [vmem:[#allocation7 + $0x184] ss:$16 sps:$4 sm:$0xff]  }
 0x2b0   :  { %v974_v39 = vmul.f32 1.442695, %v973_v38  ;;  %v2399_v38 = vld [vmem:[#allocation7 + $0x180] ss:$16 sps:$4 sm:$0xff]  }
 0x2b2   :  { %2461 = vpow2.f32 %v974_v39  ;;  %v2407_v39 = vld [vmem:[#allocation7 + $0x164] ss:$16 sps:$4 sm:$0xff]  }
 0x2bf   :  { %v2462_v47 = vpop.eup %2461 }
 0x2c0   :  { %977 = vrot.lane.b32.xlu0 %v2462_v47, %s2557_s6  ;;  %v2417_v47 = vld [vmem:[#allocation7 + $0x120] ss:$16 sps:$4 sm:$0xff]  }
 0x2c4   :  { %1904 = vrot.lane.b32.xlu0 %v2905_v36, %s2558_s26 }
 0x332   :  { %v978_v9 = vpop.permute.xlu0 %977 }
 0x333   :  { %v980_v10 = vmul.f32 %v978_v9, %v972_v8  ;;  %v2435_v8 = vld [vmem:[%s3041_s8 + $0x30] sm:$0xff]  }
 0x334   :  { %v2436_v9 = vld [vmem:[%s3041_s8 + $0xb0] sm:$0xff]  }
 0x335   :  { %v981_v11 = vadd.f32 %v980_v10, %v2905_v36  ;;  %v2393_v36 = vld [vmem:[#allocation7 + $0x1a0] ss:$16 sps:$4 sm:$0xff]   ;;  %v2437_v10 = vld [vmem:[%s3041_s8 + $0x68] sm:$0xff]  }
 0x337   :  { %v982_v13 = vpack.c.bf16 %v981_v11, %v981_v11  ;;  %v2438_v11 = vld [vmem:[%s3041_s8 + $0xe8] sm:$0xff]  }
 0x339   :  { %2020 = vmatmul.mubr.msk.bf16.vlgmr.msra.gmra.mxu1 %vm1007_vm1, %v982_v13  ;;  %v2440_v13 = vld [vmem:[%s3041_s8 + $0xa8] sm:$0xff]  }
 0x33a   :  { %1463 = vmatpush1.bf16.msra.mxu1 %v2333_v12  ;;  %v2439_v12 = vld [vmem:[%s3041_s8 + $0x28] sm:$0xff]  }
 0x33b   :  { %1464 = vmatprep.subr.bf16.mxu1 %v2341_v14  ;;  %v2441_v14 = vld [vmem:[%s3041_s8 + $0x60] sm:$0xff]  }
 0x33e   :  { %1465 = vmatpush1.bf16.msra.mxu1 %v2339_v15  ;;  %v2442_v15 = vld [vmem:[%s3041_s8 + $0xe0] sm:$0xff]  }
 0x33f   :  { %1466 = vmatprep.subr.bf16.mxu1 %v2347_v16  ;;  %v2443_v16 = vld [vmem:[%s3041_s8 + $0x20] sm:$0xff]  }
 0x342   :  { %1467 = vmatpush1.bf16.msra.mxu1 %v2345_v17  ;;  %v2444_v17 = vld [vmem:[%s3041_s8 + $0xa0] sm:$0xff]  }
 0x343   :  { %1468 = vmatprep.subr.bf16.mxu1 %v2353_v18  ;;  %v2445_v18 = vld [vmem:[%s3041_s8 + $0x58] sm:$0xff]  }
 0x346   :  { %1469 = vmatpush1.bf16.msra.mxu1 %v2351_v19  ;;  %v2446_v19 = vld [vmem:[%s3041_s8 + $0xd8] sm:$0xff]  }
 0x347   :  { %1470 = vmatprep.subr.bf16.mxu1 %v2359_v20  ;;  %v2447_v20 = vld [vmem:[%s3041_s8 + $0x18] sm:$0xff]  }
 0x34a   :  { %1471 = vmatpush1.bf16.msra.mxu1 %v2357_v21  ;;  %v2448_v21 = vld [vmem:[%s3041_s8 + $0x98] sm:$0xff]  }
 0x34b   :  { %1472 = vmatprep.subr.bf16.mxu1 %v2365_v22  ;;  %v2449_v22 = vld [vmem:[%s3041_s8 + $0x50] sm:$0xff]  }
 0x34e   :  { %1473 = vmatpush1.bf16.msra.mxu1 %v2363_v23  ;;  %v2450_v23 = vld [vmem:[%s3041_s8 + $0xd0] sm:$0xff]  }
 0x34f   :  { %1474 = vmatprep.subr.bf16.mxu1 %v2371_v24  ;;  %v2451_v24 = vld [vmem:[%s3041_s8 + $0x10] sm:$0xff]  }
 0x352   :  { %1475 = vmatpush1.bf16.msra.mxu1 %v2369_v25  ;;  %v2452_v25 = vld [vmem:[%s3041_s8 + $0x90] sm:$0xff]  }
 0x353   :  { %1476 = vmatprep.subr.bf16.mxu1 %v2377_v28  ;;  %v2453_v28 = vld [vmem:[%s3041_s8 + $0x48] sm:$0xff]  }
 0x356   :  { %1477 = vmatpush1.bf16.msra.mxu1 %v2375_v30  ;;  %v2454_v30 = vld [vmem:[%s3041_s8 + $0xc8] sm:$0xff]  }
 0x357   :  { %1478 = vmatprep.subr.bf16.mxu1 %v2383_v31  ;;  %v2455_v31 = vld [vmem:[%s3041_s8 + $0x8] sm:$0xff]  }
 0x35a   :  { %1479 = vmatpush2.bf16.msra.mxu1 %v2381_v32  ;;  %v2456_v32 = vld [vmem:[%s3041_s8 + $0x88] sm:$0xff]  }
 0x35b   :  { %1480 = vmatprep.subr.bf16.mxu1 %v2389_v33  ;;  %v2457_v33 = vld [vmem:[%s3041_s8 + $0x40] sm:$0xff]  }
 0x35e   :  { %1481 = vmatpush2.bf16.msra.mxu1 %v2387_v34  ;;  %v2458_v34 = vld [vmem:[%s3041_s8 + $0xc0] sm:$0xff]  }
 0x35f   :  { %1482 = vmatprep.subr.bf16.mxu1 %v2395_v35  ;;  %v2459_v35 = vld [vmem:[%s3041_s8] sm:$0xff]  }
 0x362   :  { %1483 = vmatpush2.bf16.msra.mxu1 %v2393_v36  ;;  %v2460_v36 = vld [vmem:[%s3041_s8 + $0x80] sm:$0xff]  }
 0x363   :  { %1484 = vmatprep.subr.bf16.mxu1 %v2401_v37  ;;  %v1120_v37 = vld [vmem:[%s3035_s2 + $0xc] sm:$0xf] }
 0x366   :  { %1485 = vmatpush2.bf16.msra.mxu1 %v2399_v38  ;;  %v1125_v38 = vrot.slane %v1120_v37, %v2829_v27 }
 0x367   :  { %1486 = vmatprep.subr.bf16.mxu1 %v2407_v39  ;;  %v1133_v39 = vrot.slane %v1120_v37, %v131_v44 }
 0x36a   :  { %1487 = vmatpush2.bf16.msra.mxu1 %v2405_v40  ;;  %v1129_v40 = vrot.slane %v1120_v37, %v2835_v29 }
 0x36b   :  { %1488 = vmatprep.subr.bf16.mxu1 %v2413_v41  ;;  %v1137_v41 = vrot.slane %v1120_v37, %v135_v45 }
 0x36e   :  { %1489 = vmatpush2.bf16.msra.mxu1 %v2411_v42 }
 0x36f   :  { %1490 = vmatprep.subr.bf16.mxu1 %v2419_v43 }
 0x372   :  { %1491 = vmatpush2.bf16.msra.mxu1 %v2417_v47 }
 0x373   :  { %1492 = vmatprep.subr.bf16.mxu1 %v2425_v49 }
 0x376   :  { %1493 = vmatpush2.bf16.msra.mxu1 %v2423_v51 }
 0x377   :  { %2141 = vmatprep.subr.bf16.mxu1 %v2429_v53 }
 0x3f9   :  { %v1045_v58 = vpop.f32.mrf.mxu1 }
 0x3fa   :  { %v1046_v59 = vadd.f32 %v1045_v58, %v990_v56 }
 0x3fb   :  { %v1047_v60 = vpop.f32.mrf.mxu1 }
 0x3fc   :  { %v1048_v61 = vadd.f32 %v1047_v60, %v994_v57  ;;  %v1052_v62 = vmax.f32 %v1046_v59, 0.0 }
 0x3fd   :  { %v1049_v0 = vpop.f32.mrf.mxu1 }
 0x3fe   :  { %v1053_v63 = vmax.f32 %v1048_v61, 0.0  ;;  %v1054_v5 = vpack.c.bf16 %v1052_v62, %v1052_v62  ;;  %v2085_v61 = vld [vmem:[%s3035_s2 + $0x10] ss:$0 sm:$0xff] }
 0x3ff   :  { %v1050_v1 = vpop.f32.mrf.mxu1 }
 0x400   :  { %v1055_v2 = vpack.c.bf16 %v1053_v63, %v1053_v63 }
 0x402   :  { %1494 = vmatprep.mubr.bf16.mxu1 %v1055_v2  ;;  %1535 = vmatprep.mubr.bf16.mxu0 %v1055_v2 }
 0x403   :  { %1495 = vmatmul.mubr.bf16.vlgmr.msra.gmra.mxu1 %v1054_v5  ;;  %1536 = vmatmul.mubr.bf16.vlgmr.msra.gmra.mxu0 %v1054_v5  ;;  %v2118_v5 = vld [vmem:[%s3035_s2 + $0x2] ss:$0 sm:$0xff] }
 0x404   :  { %2142 = vmatpush3.bf16.msra.mxu1 %v2431_v3  ;;  %2164 = vmatpush3.bf16.msra.mxu0 %v2432_v4 }
 0x405   :  { %2143 = vmatprep.subr.bf16.mxu1 %v2433_v6  ;;  %2165 = vmatprep.subr.bf16.mxu0 %v2434_v7 }
 0x408   :  { %2144 = vmatpush3.bf16.msra.mxu1 %v2435_v8  ;;  %2166 = vmatpush3.bf16.msra.mxu0 %v2436_v9 }
 0x409   :  { %2145 = vmatprep.subr.bf16.mxu1 %v2437_v10  ;;  %2167 = vmatprep.subr.bf16.mxu0 %v2438_v11  ;;  %v2463_v10 = vld [vmem:[%s3035_s2] ss:$0 sm:$0xff] }
 0x40c   :  { %2146 = vmatpush3.bf16.msra.mxu1 %v2439_v12  ;;  %2168 = vmatpush3.bf16.msra.mxu0 %v2440_v13  ;;  %v1905_v12 = vpop.permute.xlu0 %1904 }
 0x40d   :  { %2147 = vmatprep.subr.bf16.mxu1 %v2441_v14  ;;  %2169 = vmatprep.subr.bf16.mxu0 %v2442_v15 }
 0x410   :  { %2148 = vmatpush3.bf16.msra.mxu1 %v2443_v16  ;;  %2170 = vmatpush3.bf16.msra.mxu0 %v2444_v17 }
 0x411   :  { %2149 = vmatprep.subr.bf16.mxu1 %v2445_v18  ;;  %2171 = vmatprep.subr.bf16.mxu0 %v2446_v19 }
 0x414   :  { %2150 = vmatpush3.bf16.msra.mxu1 %v2447_v20  ;;  %2172 = vmatpush3.bf16.msra.mxu0 %v2448_v21 }
 0x415   :  { %2151 = vmatprep.subr.bf16.mxu1 %v2449_v22  ;;  %2173 = vmatprep.subr.bf16.mxu0 %v2450_v23 }
 0x418   :  { %2152 = vmatpush3.bf16.msra.mxu1 %v2451_v24  ;;  %2174 = vmatpush3.bf16.msra.mxu0 %v2452_v25 }
 0x419   :  { %2153 = vmatprep.subr.bf16.mxu1 %v2453_v28  ;;  %2175 = vmatprep.subr.bf16.mxu0 %v2454_v30 }
 0x41c   :  { %2154 = vmatpush3.bf16.msra.mxu1 %v2455_v31  ;;  %2176 = vmatpush3.bf16.msra.mxu0 %v2456_v32 }
 0x41d   :  { %2155 = vmatprep.subr.bf16.mxu1 %v2457_v33  ;;  %2177 = vmatprep.subr.bf16.mxu0 %v2458_v34 }
 0x420   :  { %2156 = vmatpush3.bf16.msra.mxu1 %v2459_v35  ;;  %2178 = vmatpush3.bf16.msra.mxu0 %v2460_v36 }
 0x4c3   :  { %v1496_v42 = vpop.f32.mrf.mxu1  ;;  %v1537_v43 = vpop.f32.mrf.mxu0 }
 0x4c4   :  { %v1497_v46 = vadd.f32 %v1496_v42, %v1125_v38  ;;  %v1538_v47 = vadd.f32 %v1537_v43, %v1133_v39 }
 0x4c5   :  { %v1498_v48 = vpop.f32.mrf.mxu1  ;;  %v1539_v49 = vpop.f32.mrf.mxu0 }
 0x4c6   :  { %v1499_v50 = vadd.f32 %v1498_v48, %v1129_v40  ;;  %v1540_v51 = vadd.f32 %v1539_v49, %v1137_v41  ;;  %v1544_v52 = vmax.f32 %v1497_v46, 0.0  ;;  %v1546_v53 = vmax.f32 %v1538_v47, 0.0 }
 0x4c7   :  { %v1500_v54 = vpop.f32.mrf.mxu1  ;;  %v1541_v27 = vpop.f32.mrf.mxu0 }
 0x4c8   :  { %v1545_v55 = vmax.f32 %v1499_v50, 0.0  ;;  %v1547_v56 = vmax.f32 %v1540_v51, 0.0  ;;  %v1548_v26 = vpack.c.bf16 %v1544_v52, %v1544_v52  ;;  %v1550_v45 = vpack.c.bf16 %v1546_v53, %v1546_v53 }
 0x4c9   :  { %v1501_v44 = vpop.f32.mrf.mxu1  ;;  %v1542_v57 = vpop.f32.mrf.mxu0 }
 0x4ca   :  { %v1549_v29 = vpack.c.bf16 %v1545_v55, %v1545_v55  ;;  %v1551_v58 = vpack.c.bf16 %v1547_v56, %v1547_v56 }
 0x4cc   :  { %1847 = vmatprep.mubr.bf16.mxu1 %v1549_v29  ;;  %1887 = vmatprep.mubr.bf16.mxu0 %v1551_v58 }
 0x4cd   :  { %1848 = vmatmul.mubr.bf16.vlgmr.msra.gmra.mxu1 %v1548_v26  ;;  %1888 = vmatmul.mubr.bf16.vlgmr.msra.gmra.mxu0 %v1550_v45 }
 0x58d   :  { %v2157_v59 = vpop.f32.mrf.mxu1  ;;  %v2179_v60 = vpop.f32.mrf.mxu0 }
 0x58f   :  { %v2158_v62 = vpop.f32.mrf.mxu1  ;;  %v2180_v0 = vpop.f32.mrf.mxu0 }
 0x590   :  { %v2159_v63 = vadd.f32 %v2158_v62, %v2157_v59  ;;  %v2181_v4 = vadd.f32 %v2180_v0, %v2179_v60 }
 0x591   :  { %v2160_v1 = vpop.f32.mrf.mxu1  ;;  %v2182_v2 = vpop.f32.mrf.mxu0 }
 0x592   :  { %v1850_v3 = vadd.f32 %v2159_v63, %v2085_v61 }
 0x593   :  { %v2161_v6 = vpop.f32.mrf.mxu1  ;;  %v2183_v7 = vpop.f32.mrf.mxu0 }
 0x594   :  { %v1890_v8 = vadd.f32 %v2181_v4, %v1850_v3 }
 0x596   :  { %v1901_v9 = vmul.f32 %v2118_v5, %v1890_v8 }
 0x598   :  { %v1902_v11 = vadd.f32 %v2463_v10, %v1901_v9 }
 0x59a   :  { %v1907_v13 = vsel %vm221_vm0, %v1902_v11, %v1905_v12 }
 0x59b   :  { %1909 = vst.msk [vmem:[%s3042_s9] sm:$0xff] %vm1908_vm2, %v1907_v13 }
 0x59c   :  { %1914 = vsyncpa [#allocation3], 1 }
 0x59d   :  { %1915 = vsyncpa [#allocation5], 1 }
 0x59e   :  { %1916 = vsyncpa [#allocation8], 1 }

</bundles_post_ra>
